<compile_context>
chip_gen: v7x
topology: tpu7x:2x2x1
jax: 0.10.0
libtpu: 0.0.40
codegen_flags: <defaults>
</compile_context>

<pallas_src>
import jax
import jax.numpy as jnp
from jax.experimental import pallas as pl
from jax.experimental.pallas import tpu as pltpu

BN_EPS = 1e-5
LANE = 128
_MAX_SINGLE_K = 1024     # below this, layer-1 K stays one resident block


def _round_up(n, m):
    return ((n + m - 1) // m) * m


def _feature_pad(n):
    # 256-multiples fill v6e/v7x's 2x256^2 MXUs; 128 (one lane tile / v5e MXU
    # width) when the real dim is smaller than that.
    return 128 if n <= 128 else _round_up(n, 256)


def _k_tiling(in_feature):
    """Return (in_p, tk): padded layer-1 K extent and its pipeline tile size."""
    if in_feature <= _MAX_SINGLE_K:
        return in_feature, in_feature          # single K block, no padding needed
    in_p = _round_up(in_feature, 256)
    for tk in (1024, 512, 256):                # largest MXU-friendly divisor
        if in_p % tk == 0:
            return in_p, tk
    return in_p, 256


def _vmem_limit_bytes(b_pad, h_p, tk, out_p):
    # Explicit VMEM budget sized against v7x's 64 MiB physical (default scoped
    # limits are only 16 MiB on v5e / 32 MiB on v6e/v7x):
    # double-buffered pipelined tiles (x, W1) + resident operands + accumulator
    # + headroom for in-kernel temporaries.
    est = (2 * b_pad * tk * 4                      # x tiles (f32, 2 bufs)
           + 2 * tk * h_p * 2                      # W1 tiles (bf16, 2 bufs)
           + (h_p * h_p + h_p * out_p) * 2         # W2 + W3 (bf16, resident)
           + (8 * h_p + out_p + 2 * b_pad * out_p) * 4   # bn + b3 + out bufs
           + b_pad * h_p * 4                       # f32 accumulator scratch
           + 4 * b_pad * h_p * 4)                  # activation temporaries
    return min(64 << 20, max(32 << 20, 2 * est))


# ----------------------------------------------------------------------------
# Kernel
# ----------------------------------------------------------------------------
def _bn_relu(h, gamma, beta, inv_n, valid):
    """Training-mode BatchNorm1d (biased, two-pass variance) + ReLU, fused.

    Stats stay f32 (v5e has no bf16 VPU/EUP path); the bf16 cast is fused into
    the ReLU epilogue so the live (B, Hp) activation between layers is
    half-width.  `valid` masks padded batch rows out of the statistics
    (None when the batch is not padded)."""
    mu = jnp.sum(h, axis=0, keepdims=True) * inv_n
    d = h - mu
    dv = jnp.where(valid, d, 0.0) if valid is not None else d
    var = jnp.sum(dv * dv, axis=0, keepdims=True) * inv_n
    scale = jax.lax.rsqrt(var + BN_EPS) * gamma           # EUP
    out = jnp.maximum(d * scale + beta, 0.0)              # == (h-mu)*g/sqrt(v+eps)+b
    if valid is not None:
        out = jnp.where(valid, out, 0.0)                  # padded rows stay exactly 0
    return out.astype(jnp.bfloat16)


def _make_kernel(batch, b_pad):
    """batch / b_pad are static, so the real-B divisor and the row mask are
    compile-time constants (no SMEM scalar needed)."""
    inv_n = 1.0 / batch
    need_mask = b_pad > batch

    def kernel(x_ref, w1_ref, w2_ref, w3_ref, bn_ref, b3_ref, o_ref, acc_ref):
        # x_ref : (Bp, tk)  f32  (bf16 cast done here, hidden under the MXU)
        # w1_ref: (tk, Hp)  bf16 (K-tiled, double-buffered by Pallas)
        # w2_ref: (Hp, Hp)  bf16      w3_ref: (Hp, 128) bf16 (only col 0 real)
        # bn_ref: (8, Hp)   f32  rows = [g1, b1, g2, b2, 0, 0, 0, 0]
        # b3_ref: (1, 128)  f32       o_ref : (Bp, 128) f32 (col 0 is the output)
        # acc_ref: (Bp, Hp) f32 scratch, resident across the K grid.
        k = pl.program_id(0)
        part = jnp.dot(x_ref[...].astype(jnp.bfloat16), w1_ref[...],
                       preferred_element_type=jnp.float32)

        @pl.when(k == 0)
        def _():
            acc_ref[...] = part

        @pl.when(k != 0)
        def _():
            acc_ref[...] = acc_ref[...] + part

        @pl.when(k == pl.num_programs(0) - 1)
        def _():
            bn = bn_ref[...]
            if need_mask:
                valid = jax.lax.broadcasted_iota(jnp.int32, (b_pad, 1), 0) < batch
            else:
                valid = None
            # layer1 (+ cancelled b1) -> bn1 -> relu1  (bf16 out)
            h = _bn_relu(acc_ref[...], bn[0:1, :], bn[1:2, :], inv_n, valid)
            # layer2 (+ cancelled b2) -> bn2 -> relu2  (bf16 out)
            h = jnp.dot(h, w2_ref[...], preferred_element_type=jnp.float32)
            h = _bn_relu(h, bn[2:3, :], bn[3:4, :], inv_n, valid)
            # layer3 -> sigmoid (lane-dense 128-wide store; wrapper slices col 0)
            logits = jnp.dot(h, w3_ref[...],
                             preferred_element_type=jnp.float32) + b3_ref[...]
            o_ref[...] = jax.nn.sigmoid(logits)

    return kernel


# ----------------------------------------------------------------------------
# Host-side wrappers
# ----------------------------------------------------------------------------
def prepare_params(params):
    """One-time (amortized) repack: pad feature dims to MXU-friendly multiples,
    cast matmul weights to bf16, stack+pad BN affine params. b1/b2 are dropped
    (exactly cancelled by training-mode BN mean subtraction)."""
    in_feature, hidden = params["w1"].shape
    in_p, tk = _k_tiling(in_feature)
    h_p = _feature_pad(hidden)
    out_p = LANE

    def pad2(a, rows, cols):
        return jnp.pad(a, ((0, rows - a.shape[0]), (0, cols - a.shape[1])))

    # gamma padded with 0 => padded hidden columns stay exactly 0 through BN/ReLU.
    bn = jnp.concatenate(
        [pad2(params["g1"], 1, h_p), pad2(params["be1"], 1, h_p),
         pad2(params["g2"], 1, h_p), pad2(params["be2"], 1, h_p)], axis=0)
    bn = jnp.pad(bn, ((0, 8 - bn.shape[0]), (0, 0)))   # full (8,128) sublane tile

    return {
        "w1": pad2(params["w1"], in_p, h_p).astype(jnp.bfloat16),
        "w2": pad2(params["w2"], h_p, h_p).astype(jnp.bfloat16),
        "w3": pad2(params["w3"], h_p, out_p).astype(jnp.bfloat16),
        "bn": bn,
        "b3": pad2(params["b3"], 1, out_p),
        "tk": tk,                                      # static tiling metadata
    }


def domain_discriminator(x, prepped):
    """x: (B, in_feature) float32. prepped: output of prepare_params()."""
    batch, in_feature = x.shape
    in_p, h_p = prepped["w1"].shape
    out_p = prepped["w3"].shape[1]
    tk = prepped["tk"]
    num_k = in_p // tk
    b_pad = _round_up(batch, 8)       # f32 sublane multiple -> unmasked vld/vst

    if (b_pad, in_p) != (batch, in_feature):
        # Cheap f32 zero-pad only when misaligned (no-op at aligned sizes).
        # The expensive bf16 cast (an extra HBM pass before) is now in-kernel.
        x = jnp.pad(x, ((0, b_pad - batch), (0, in_p - in_feature)))

    kernel = _make_kernel(batch, b_pad)

    flops = 2 * b_pad * (in_p * h_p + h_p * h_p + h_p * out_p)
    transcendentals = 2 * h_p + b_pad * out_p           # 2x rsqrt + sigmoid
    bytes_accessed = (x.size * 4
                      + (prepped["w1"].size + prepped["w2"].size
                         + prepped["w3"].size) * 2
                      + (prepped["bn"].size + prepped["b3"].size) * 4
                      + b_pad * out_p * 4)

    out = pl.pallas_call(
        kernel,
        out_shape=jax.ShapeDtypeStruct((b_pad, out_p), jnp.float32),
        grid=(num_k,),
        in_specs=[
            pl.BlockSpec((b_pad, tk), lambda k: (0, k)),    # x: K-tiled
            pl.BlockSpec((tk, h_p), lambda k: (k, 0)),      # W1: K-tiled, pipelined
            pl.BlockSpec((h_p, h_p), lambda k: (0, 0)),     # W2: resident
            pl.BlockSpec((h_p, out_p), lambda k: (0, 0)),   # W3: resident
            pl.BlockSpec((8, h_p), lambda k: (0, 0)),       # BN affine: resident
            pl.BlockSpec((1, out_p), lambda k: (0, 0)),     # b3: resident
        ],
        out_specs=pl.BlockSpec((b_pad, out_p), lambda k: (0, 0)),
        scratch_shapes=[pltpu.VMEM((b_pad, h_p), jnp.float32)],
        compiler_params=pltpu.CompilerParams(
            dimension_semantics=("arbitrary",),             # K is a reduction axis
            vmem_limit_bytes=_vmem_limit_bytes(b_pad, h_p, tk, out_p)),
        cost_estimate=pl.CostEstimate(flops=flops,
                                      transcendentals=transcendentals,
                                      bytes_accessed=bytes_accessed),
    )(x, prepped["w1"], prepped["w2"], prepped["w3"], prepped["bn"], prepped["b3"])
    return out[:batch, :1]


# ----------------------------------------------------------------------------
# Parameter init (PyTorch-style) and references
# ----------------------------------------------------------------------------
def init_params(key, in_feature, hidden_size):
    """Linear weights stored pre-transposed as (in, out); biases/affine (1, out).
    b1/b2 are created (module has them) but the kernel drops them exactly."""
    k1, k2, k3 = jax.random.split(key, 3)

    def lin(k, fan_in, fan_out):
        bound = 1.0 / jnp.sqrt(fan_in)
        kw, kb = jax.random.split(k)
        w = jax.random.uniform(kw, (fan_in, fan_out), jnp.float32, -bound, bound)
        b = jax.random.uniform(kb, (1, fan_out), jnp.float32, -bound, bound)
        return w, b

    w1, b1 = lin(k1, in_feature, hidden_size)
    w2, b2 = lin(k2, hidden_size, hidden_size)
    w3, b3 = lin(k3, hidden_size, 1)
    return {
        "w1": w1, "b1": b1,
        "g1": jnp.ones((1, hidden_size), jnp.float32),
        "be1": jnp.zeros((1, hidden_size), jnp.float32),
        "w2": w2, "b2": b2,
        "g2": jnp.ones((1, hidden_size), jnp.float32),
        "be2": jnp.zeros((1, hidden_size), jnp.float32),
        "w3": w3, "b3": b3,
    }


def _reference_f32(x, p):
    """Faithful f32 translation of the PyTorch module (with biases)."""
    def bn(h, g, b):
        mu = jnp.mean(h, axis=0, keepdims=True)
        var = jnp.mean((h - mu) ** 2, axis=0, keepdims=True)
        return (h - mu) / jnp.sqrt(var + BN_EPS) * g + b

    h = jnp.maximum(bn(x @ p["w1"] + p["b1"], p["g1"], p["be1"]), 0.0)
    h = jnp.maximum(bn(h @ p["w2"] + p["b2"], p["g2"], p["be2"]), 0.0)
    return jax.nn.sigmoid(h @ p["w3"] + p["b3"])


def _reference_bf16(x, p):
    """Pure-JAX mirror of the kernel numerics (bf16 dot inputs, f32 stats,
    two-pass variance, cancelled biases) for a tight correctness check."""
    def dot_bf16(a, w):
        return jnp.dot(a.astype(jnp.bfloat16), w.astype(jnp.bfloat16),
                       preferred_element_type=jnp.float32)

    def bn_relu(h, g, b):
        mu = jnp.mean(h, axis=0, keepdims=True)
        d = h - mu
        var = jnp.mean(d * d, axis=0, keepdims=True)
        scale = jax.lax.rsqrt(var + BN_EPS) * g
        return jnp.maximum(d * scale + b, 0.0).astype(jnp.bfloat16)

    h = bn_relu(dot_bf16(x, p["w1"]), p["g1"], p["be1"])
    h = bn_relu(jnp.dot(h, p["w2"].astype(jnp.bfloat16),
                        preferred_element_type=jnp.float32), p["g2"], p["be2"])
    logits = jnp.dot(h, p["w3"].astype(jnp.bfloat16),
                     preferred_element_type=jnp.float32) + p["b3"]
    return jax.nn.sigmoid(logits)


if __name__ == "__main__":
    key = jax.random.PRNGKey(0)
    kx, kp = jax.random.split(key)

    batch, in_feature, hidden_size = 8, 32, 32
    x = jax.random.normal(kx, (batch, in_feature), jnp.float32)
    params = init_params(kp, in_feature, hidden_size)
    prepped = prepare_params(params)

    y = jax.block_until_ready(domain_discriminator(x, prepped))
    assert y.shape == (batch, 1)

    # Tight check vs. a reference that mirrors the kernel's bf16/f32 numerics.
    y_bf16 = _reference_bf16(x, params)
    assert jnp.allclose(y, y_bf16, atol=1e-4, rtol=1e-4), (y, y_bf16)

    # Loose sanity check vs. the full-f32 PyTorch-faithful reference
    # (difference is only bf16 weight/activation rounding).
    y_f32 = _reference_f32(x, params)
    assert jnp.max(jnp.abs(y - y_f32)) < 5e-2, (y, y_f32)

    print("KERNEL_OK")
</pallas_src>

<mosaic_0001>
module attributes {stable_mosaic.version = 11 : i64} {
  func.func @kernel(%arg0: i32, %arg1: memref<8x32xf32, #tpu.memory_space<vmem>>, %arg2: memref<32x128xbf16, #tpu.memory_space<vmem>>, %arg3: memref<128x128xbf16, #tpu.memory_space<vmem>>, %arg4: memref<128x128xbf16, #tpu.memory_space<vmem>>, %arg5: memref<8x128xf32, #tpu.memory_space<vmem>>, %arg6: memref<1x128xf32, #tpu.memory_space<vmem>>, %arg7: memref<8x128xf32, #tpu.memory_space<vmem>>, %arg8: memref<8x128xf32, #tpu.memory_space<vmem>>) attributes {dimension_semantics = [#tpu.dimension_semantics<arbitrary>], iteration_bounds = array<i64: 1>, scalar_prefetch = 0 : i64, scratch_operands = 1 : i64, tpu.core_type = #tpu.core_type<tc>, window_params = [{transform_indices = @transform_0, window_bounds = array<i64: 8, 32>}, {transform_indices = @transform_1, window_bounds = array<i64: 32, 128>}, {pipeline_mode = #tpu.pipeline_mode<synchronous>, transform_indices = @transform_2, window_bounds = array<i64: 128, 128>}, {pipeline_mode = #tpu.pipeline_mode<synchronous>, transform_indices = @transform_3, window_bounds = array<i64: 128, 128>}, {pipeline_mode = #tpu.pipeline_mode<synchronous>, transform_indices = @transform_4, window_bounds = array<i64: 8, 128>}, {pipeline_mode = #tpu.pipeline_mode<synchronous>, transform_indices = @transform_5, window_bounds = array<i64: 1, 128>}, {pipeline_mode = #tpu.pipeline_mode<synchronous>, transform_indices = @transform_6, window_bounds = array<i64: 8, 128>}]} {
    %c0 = arith.constant 0 : index
    %c0_0 = arith.constant 0 : index
    %0 = vector.load %arg1[%c0, %c0_0] : memref<8x32xf32, #tpu.memory_space<vmem>>, vector<8x32xf32>
    %1 = arith.truncf %0 : vector<8x32xf32> to vector<8x32xbf16>
    %c0_1 = arith.constant 0 : index
    %c0_2 = arith.constant 0 : index
    %2 = vector.load %arg2[%c0_1, %c0_2] : memref<32x128xbf16, #tpu.memory_space<vmem>>, vector<32x128xbf16>
    %cst = arith.constant dense<0.000000e+00> : vector<8x128xf32>
    %3 = tpu.matmul %1, %2, %cst {dimension_numbers = #tpu.dot_dimension_numbers<[1], [0], [0], [1], [0, 0, 1, 1], [], []>} : vector<8x32xbf16>, vector<32x128xbf16>, vector<8x128xf32> -> vector<8x128xf32>
    %c0_i32 = arith.constant 0 : i32
    %4 = arith.cmpi eq, %arg0, %c0_i32 : i32
    %5 = arith.extui %4 : i1 to i32
    %c0_i32_3 = arith.constant 0 : i32
    %6 = arith.cmpi ne, %5, %c0_i32_3 : i32
    scf.if %6 {
      %c0_8 = arith.constant 0 : index
      %c0_9 = arith.constant 0 : index
      %13 = vector.load %arg8[%c0_8, %c0_9] : memref<8x128xf32, #tpu.memory_space<vmem>>, vector<8x128xf32>
      tpu.vector_store %arg8[%c0_8, %c0_9], %3 {strides = array<i32>} : memref<8x128xf32, #tpu.memory_space<vmem>>, vector<8x128xf32>,
    } else {
    }
    %c0_i32_4 = arith.constant 0 : i32
    %7 = arith.cmpi ne, %arg0, %c0_i32_4 : i32
    %8 = arith.extui %7 : i1 to i32
    %c0_i32_5 = arith.constant 0 : i32
    %9 = arith.cmpi ne, %8, %c0_i32_5 : i32
    scf.if %9 {
      %c0_8 = arith.constant 0 : index
      %c0_9 = arith.constant 0 : index
      %13 = vector.load %arg8[%c0_8, %c0_9] : memref<8x128xf32, #tpu.memory_space<vmem>>, vector<8x128xf32>
      %14 = arith.addf %13, %3 : vector<8x128xf32>
      %c0_10 = arith.constant 0 : index
      %c0_11 = arith.constant 0 : index
      %15 = vector.load %arg8[%c0_10, %c0_11] : memref<8x128xf32, #tpu.memory_space<vmem>>, vector<8x128xf32>
      tpu.vector_store %arg8[%c0_10, %c0_11], %14 {strides = array<i32>} : memref<8x128xf32, #tpu.memory_space<vmem>>, vector<8x128xf32>,
    } else {
    }
    %c0_i32_6 = arith.constant 0 : i32
    %10 = arith.cmpi eq, %arg0, %c0_i32_6 : i32
    %11 = arith.extui %10 : i1 to i32
    %c0_i32_7 = arith.constant 0 : i32
    %12 = arith.cmpi ne, %11, %c0_i32_7 : i32
    scf.if %12 {
      %c0_8 = arith.constant 0 : index
      %c0_9 = arith.constant 0 : index
      %13 = vector.load %arg5[%c0_8, %c0_9] : memref<8x128xf32, #tpu.memory_space<vmem>>, vector<8x128xf32>
      %c0_10 = arith.constant 0 : index
      %c0_11 = arith.constant 0 : index
      %14 = vector.load %arg8[%c0_10, %c0_11] : memref<8x128xf32, #tpu.memory_space<vmem>>, vector<8x128xf32>
      %15 = vector.extract_strided_slice %13 {offsets = [0, 0], sizes = [1, 128], strides = [1, 1]} : vector<8x128xf32> to vector<1x128xf32>
      %16 = vector.extract_strided_slice %13 {offsets = [1, 0], sizes = [1, 128], strides = [1, 1]} : vector<8x128xf32> to vector<1x128xf32>
      %cst_12 = arith.constant dense<0.000000e+00> : vector<128xf32>
      %17 = vector.multi_reduction <add>, %14, %cst_12 [0] : vector<8x128xf32> to vector<128xf32>
      %18 = vector.shape_cast %17 : vector<128xf32> to vector<1x128xf32>
      %cst_13 = arith.constant 1.250000e-01 : f32
      %19 = vector.broadcast %cst_13 : f32 to vector<1x128xf32>
      %20 = arith.mulf %18, %19 : vector<1x128xf32>
      %21 = vector.broadcast %20 : vector<1x128xf32> to vector<8x128xf32>
      %22 = arith.subf %14, %21 : vector<8x128xf32>
      %23 = arith.mulf %22, %22 : vector<8x128xf32>
      %cst_14 = arith.constant dense<0.000000e+00> : vector<128xf32>
      %24 = vector.multi_reduction <add>, %23, %cst_14 [0] : vector<8x128xf32> to vector<128xf32>
      %25 = vector.shape_cast %24 : vector<128xf32> to vector<1x128xf32>
      %cst_15 = arith.constant 1.250000e-01 : f32
      %26 = vector.broadcast %cst_15 : f32 to vector<1x128xf32>
      %27 = arith.mulf %25, %26 : vector<1x128xf32>
      %cst_16 = arith.constant 9.99999974E-6 : f32
      %28 = vector.broadcast %cst_16 : f32 to vector<1x128xf32>
      %29 = arith.addf %27, %28 : vector<1x128xf32>
      %30 = math.rsqrt %29 : vector<1x128xf32>
      %31 = arith.mulf %30, %15 : vector<1x128xf32>
      %32 = vector.broadcast %31 : vector<1x128xf32> to vector<8x128xf32>
      %33 = arith.mulf %22, %32 : vector<8x128xf32>
      %34 = vector.broadcast %16 : vector<1x128xf32> to vector<8x128xf32>
      %35 = arith.addf %33, %34 : vector<8x128xf32>
      %cst_17 = arith.constant 0.000000e+00 : f32
      %36 = vector.broadcast %cst_17 : f32 to vector<8x128xf32>
      %37 = arith.maximumf %35, %36 : vector<8x128xf32>
      %38 = arith.truncf %37 : vector<8x128xf32> to vector<8x128xbf16>
      %c0_18 = arith.constant 0 : index
      %c0_19 = arith.constant 0 : index
      %39 = vector.load %arg3[%c0_18, %c0_19] : memref<128x128xbf16, #tpu.memory_space<vmem>>, vector<128x128xbf16>
      %cst_20 = arith.constant dense<0.000000e+00> : vector<8x128xf32>
      %40 = tpu.matmul %38, %39, %cst_20 {dimension_numbers = #tpu.dot_dimension_numbers<[1], [0], [0], [1], [0, 0, 1, 1], [], []>} : vector<8x128xbf16>, vector<128x128xbf16>, vector<8x128xf32> -> vector<8x128xf32>
      %41 = vector.extract_strided_slice %13 {offsets = [2, 0], sizes = [1, 128], strides = [1, 1]} : vector<8x128xf32> to vector<1x128xf32>
      %42 = vector.extract_strided_slice %13 {offsets = [3, 0], sizes = [1, 128], strides = [1, 1]} : vector<8x128xf32> to vector<1x128xf32>
      %cst_21 = arith.constant dense<0.000000e+00> : vector<128xf32>
      %43 = vector.multi_reduction <add>, %40, %cst_21 [0] : vector<8x128xf32> to vector<128xf32>
      %44 = vector.shape_cast %43 : vector<128xf32> to vector<1x128xf32>
      %cst_22 = arith.constant 1.250000e-01 : f32
      %45 = vector.broadcast %cst_22 : f32 to vector<1x128xf32>
      %46 = arith.mulf %44, %45 : vector<1x128xf32>
      %47 = vector.broadcast %46 : vector<1x128xf32> to vector<8x128xf32>
      %48 = arith.subf %40, %47 : vector<8x128xf32>
      %49 = arith.mulf %48, %48 : vector<8x128xf32>
      %cst_23 = arith.constant dense<0.000000e+00> : vector<128xf32>
      %50 = vector.multi_reduction <add>, %49, %cst_23 [0] : vector<8x128xf32> to vector<128xf32>
      %51 = vector.shape_cast %50 : vector<128xf32> to vector<1x128xf32>
      %cst_24 = arith.constant 1.250000e-01 : f32
      %52 = vector.broadcast %cst_24 : f32 to vector<1x128xf32>
      %53 = arith.mulf %51, %52 : vector<1x128xf32>
      %cst_25 = arith.constant 9.99999974E-6 : f32
      %54 = vector.broadcast %cst_25 : f32 to vector<1x128xf32>
      %55 = arith.addf %53, %54 : vector<1x128xf32>
      %56 = math.rsqrt %55 : vector<1x128xf32>
      %57 = arith.mulf %56, %41 : vector<1x128xf32>
      %58 = vector.broadcast %57 : vector<1x128xf32> to vector<8x128xf32>
      %59 = arith.mulf %48, %58 : vector<8x128xf32>
      %60 = vector.broadcast %42 : vector<1x128xf32> to vector<8x128xf32>
      %61 = arith.addf %59, %60 : vector<8x128xf32>
      %cst_26 = arith.constant 0.000000e+00 : f32
      %62 = vector.broadcast %cst_26 : f32 to vector<8x128xf32>
      %63 = arith.maximumf %61, %62 : vector<8x128xf32>
      %64 = arith.truncf %63 : vector<8x128xf32> to vector<8x128xbf16>
      %c0_27 = arith.constant 0 : index
      %c0_28 = arith.constant 0 : index
      %65 = vector.load %arg4[%c0_27, %c0_28] : memref<128x128xbf16, #tpu.memory_space<vmem>>, vector<128x128xbf16>
      %cst_29 = arith.constant dense<0.000000e+00> : vector<8x128xf32>
      %66 = tpu.matmul %64, %65, %cst_29 {dimension_numbers = #tpu.dot_dimension_numbers<[1], [0], [0], [1], [0, 0, 1, 1], [], []>} : vector<8x128xbf16>, vector<128x128xbf16>, vector<8x128xf32> -> vector<8x128xf32>
      %c0_30 = arith.constant 0 : index
      %c0_31 = arith.constant 0 : index
      %67 = vector.load %arg6[%c0_30, %c0_31] : memref<1x128xf32, #tpu.memory_space<vmem>>, vector<1x128xf32>
      %68 = vector.broadcast %67 : vector<1x128xf32> to vector<8x128xf32>
      %69 = arith.addf %66, %68 : vector<8x128xf32>
      %70 = arith.negf %69 : vector<8x128xf32>
      %71 = math.exp %70 : vector<8x128xf32>
      %cst_32 = arith.constant 1.000000e+00 : f32
      %72 = vector.broadcast %cst_32 : f32 to vector<8x128xf32>
      %73 = arith.addf %72, %71 : vector<8x128xf32>
      %74 = arith.divf %72, %73 : vector<8x128xf32>
      %c0_33 = arith.constant 0 : index
      %c0_34 = arith.constant 0 : index
      %75 = vector.load %arg7[%c0_33, %c0_34] : memref<8x128xf32, #tpu.memory_space<vmem>>, vector<8x128xf32>
      tpu.vector_store %arg7[%c0_33, %c0_34], %74 {strides = array<i32>} : memref<8x128xf32, #tpu.memory_space<vmem>>, vector<8x128xf32>,
    } else {
    }
    return
  }
  func.func @transform_0(%arg0: i32) -> (i32, i32) {
    %c0_i32 = arith.constant 0 : i32
    %c0_i32_0 = arith.constant 0 : i32
    return %c0_i32, %arg0 : i32, i32
  }
  func.func @transform_1(%arg0: i32) -> (i32, i32) {
    %c0_i32 = arith.constant 0 : i32
    %c0_i32_0 = arith.constant 0 : i32
    return %arg0, %c0_i32 : i32, i32
  }
  func.func @transform_2(%arg0: i32) -> (i32, i32) {
    %c0_i32 = arith.constant 0 : i32
    %c0_i32_0 = arith.constant 0 : i32
    %c0_i32_1 = arith.constant 0 : i32
    return %c0_i32, %c0_i32_0 : i32, i32
  }
  func.func @transform_3(%arg0: i32) -> (i32, i32) {
    %c0_i32 = arith.constant 0 : i32
    %c0_i32_0 = arith.constant 0 : i32
    %c0_i32_1 = arith.constant 0 : i32
    return %c0_i32, %c0_i32_0 : i32, i32
  }
  func.func @transform_4(%arg0: i32) -> (i32, i32) {
    %c0_i32 = arith.constant 0 : i32
    %c0_i32_0 = arith.constant 0 : i32
    %c0_i32_1 = arith.constant 0 : i32
    return %c0_i32, %c0_i32_0 : i32, i32
  }
  func.func @transform_5(%arg0: i32) -> (i32, i32) {
    %c0_i32 = arith.constant 0 : i32
    %c0_i32_0 = arith.constant 0 : i32
    %c0_i32_1 = arith.constant 0 : i32
    return %c0_i32, %c0_i32_0 : i32, i32
  }
  func.func @transform_6(%arg0: i32) -> (i32, i32) {
    %c0_i32 = arith.constant 0 : i32
    %c0_i32_0 = arith.constant 0 : i32
    %c0_i32_1 = arith.constant 0 : i32
    return %c0_i32, %c0_i32_0 : i32, i32
  }
}

</mosaic_0001>

<bundles_post_ra>
// kernel: tpu_custom_call.1
= control target key start
LH: loop header
LB: loop body
LE: loop exit
PB: predicated region body
PF: predicated region fallthrough
CT: control target
= control target key end

     0   :  { %11 = vsyncpa [#allocation4], 0  ;;  %s847_s0 = inlined_call_operand.hbm [shape: f32[8,32], index: 0, kind: input, shape index: {}]   ;;  %s848_s1 = inlined_call_operand.hbm [shape: bf16[32,128], index: 1, kind: input, shape index: {}]   ;;  %s849_s2 = inlined_call_operand.hbm [shape: bf16[128,128], index: 2, kind: input, shape index: {}]   ;;  %s850_s3 = inlined_call_operand.hbm [shape: bf16[128,128], index: 3, kind: input, shape index: {}]   ;;  %s851_s4 = inlined_call_operand.vmem [shape: f32[8,128], index: 4, kind: input, shape index: {}]   ;;  %s852_s5 = inlined_call_operand.vmem [shape: f32[1,128], index: 5, kind: input, shape index: {}]   ;;  %s853_s6 = inlined_call_operand.hbm [shape: f32[8,128], index: 6, kind: output, shape index: {}]  }
   0x1   :  { %12 = vsyncpa [#allocation7], 0 }
   0x2   :  { %13 = vsyncpa [#allocation10], 0 }
   0x3   :  { %14 = vsyncpa [#allocation5], 0  ;;  %s701_s21 = smov [#allocation6]   ;;  %s583_s25 = scalar_lea.hbm %s848_s1, 256 }
   0x4   :  { %s30_s22 = sshll.u32 %s701_s21, 4  ;;  %p584_p0 = scmp.ne.s32.totalorder %s848_s1, %s583_s25  ;;  %s31_s22 = int_to_ptr.vmem [resolvable:$true] %s30_s22 }
   0x5   :  { %p587_p1 = scmp.lt.u32.totalorder %s583_s25, %s848_s1 }
   0x7   :  { %p589_p2 = pnand %p587_p1, %p584_p0 }
   0x9   :  { %592 = shalt.err (!%p589_p2)
}
   0xa   :  { %s593_s30 = scalar_lea.vmem %s31_s22, 256  ;;  %p598_p4 = scmp.lt.s32.totalorder %s31_s22, %s31_s22 }
   0xb   :  { %p594_p3 = scmp.ne.s32.totalorder %s31_s22, %s593_s30  ;;  %p599_p5 = scmp.lt.s32.totalorder %s593_s30, %s593_s30 }
   0xd   :  { %p600_p6 = por %p599_p5, %p598_p4 }
   0xf   :  { %p601_p7 = pnand %p600_p6, %p594_p3 }
  0x11   :  { %604 = shalt.err (!%p601_p7)
}
  0x12   :  { %s702_s7 = smov 64   ;;  %s703_s8 = smov 4  }
  0x13   :  { %36 = dma.hbm_to_vmem [thread:$0]  %s848_s1, 256, %s31_s22, [#allocation7], %s702_s7, %s702_s7, %s703_s8  }
  0x14   :  { %s704_s11 = smov [#allocation3]   ;;  %s705_s13 = smov [#allocation8]  }
  0x15   :  { %s21_s12 = sshll.u32 %s704_s11, 4  ;;  %s42_s14 = sshll.u32 %s705_s13, 4  ;;  %s22_s12 = int_to_ptr.vmem [resolvable:$true] %s21_s12  ;;  %s43_s14 = int_to_ptr.vmem [resolvable:$true] %s42_s14 }
  0x16   :  { %s605_s17 = scalar_lea.hbm %s847_s0, 128 }
  0x17   :  { %p606_p8 = scmp.ne.s32.totalorder %s847_s0, %s605_s17  ;;  %p609_p9 = scmp.lt.u32.totalorder %s605_s17, %s847_s0 }
  0x19   :  { %p611_p10 = pnand %p609_p9, %p606_p8 }
  0x1b   :  { %614 = shalt.err (!%p611_p10)
}
  0x1c   :  { %s615_s1 = scalar_lea.vmem %s22_s12, 128  ;;  %p620_p12 = scmp.lt.s32.totalorder %s22_s12, %s22_s12 }
  0x1d   :  { %p616_p11 = scmp.ne.s32.totalorder %s22_s12, %s615_s1  ;;  %p621_p13 = scmp.lt.s32.totalorder %s615_s1, %s615_s1 }
  0x1f   :  { %p622_p0 = por %p621_p13, %p620_p12 }
  0x21   :  { %p623_p1 = pnand %p622_p0, %p616_p11 }
  0x23   :  { %626 = shalt.err (!%p623_p1)
}
  0x24   :  { %24 = dma.hbm_to_vmem [thread:$0]  %s847_s0, 128, %s22_s12, [#allocation4]  }
  0x25   :  { %s627_s26 = scalar_lea.hbm %s849_s2, 1024 }
  0x26   :  { %p628_p2 = scmp.ne.s32.totalorder %s849_s2, %s627_s26  ;;  %p631_p3 = scmp.lt.u32.totalorder %s627_s26, %s849_s2 }
  0x28   :  { %p633_p4 = pnand %p631_p3, %p628_p2 }
  0x2a   :  { %636 = shalt.err (!%p633_p4)
}
  0x2b   :  { %s637_s9 = scalar_lea.vmem %s43_s14, 1024  ;;  %p642_p6 = scmp.lt.s32.totalorder %s43_s14, %s43_s14 }
  0x2c   :  { %p638_p5 = scmp.ne.s32.totalorder %s43_s14, %s637_s9  ;;  %p643_p7 = scmp.lt.s32.totalorder %s637_s9, %s637_s9 }
  0x2e   :  { %p644_p8 = por %p643_p7, %p642_p6 }
  0x30   :  { %p645_p9 = pnand %p644_p8, %p638_p5 }
  0x32   :  { %648 = shalt.err (!%p645_p9)
}
  0x33   :  { %48 = dma.hbm_to_vmem [thread:$0]  %s849_s2, 1024, %s43_s14, [#allocation7], %s702_s7, %s702_s7, %s703_s8  }
  0x34   :  { %s706_s11 = smov [#allocation9]   ;;  %s649_s16 = scalar_lea.hbm %s850_s3, 1024 }
  0x35   :  { %s54_s12 = sshll.u32 %s706_s11, 4  ;;  %p650_p10 = scmp.ne.s32.totalorder %s850_s3, %s649_s16  ;;  %s55_s12 = int_to_ptr.vmem [resolvable:$true] %s54_s12 }
  0x36   :  { %p653_p11 = scmp.lt.u32.totalorder %s649_s16, %s850_s3 }
  0x38   :  { %p655_p12 = pnand %p653_p11, %p650_p10 }
  0x3a   :  { %658 = shalt.err (!%p655_p12)
}
  0x3b   :  { %s659_s21 = scalar_lea.vmem %s55_s12, 1024  ;;  %p664_p0 = scmp.lt.s32.totalorder %s55_s12, %s55_s12 }
  0x3c   :  { %p660_p13 = scmp.ne.s32.totalorder %s55_s12, %s659_s21  ;;  %p665_p1 = scmp.lt.s32.totalorder %s659_s21, %s659_s21 }
  0x3e   :  { %p666_p2 = por %p665_p1, %p664_p0 }
  0x40   :  { %p667_p3 = pnand %p666_p2, %p660_p13 }
  0x42   :  { %670 = shalt.err (!%p667_p3)
}
  0x43   :  { %60 = dma.hbm_to_vmem [thread:$0]  %s850_s3, 1024, %s55_s12, [#allocation10], %s702_s7, %s702_s7, %s703_s8  }
  0x44   :  { %693 = dma.done.wait [#allocation4], 128  }
  0x45   :  { %694 = vsyncadd [#allocation4], 4294967168 }
  0x46   :  { %695 = dma.done.wait [#allocation7], 1280  }
  0x47   :  { %696 = vsyncadd [#allocation7], 4294966016 }
  0x48   :  { %697 = dma.done.wait [#allocation10], 1024  }
  0x49   :  { %698 = vsyncadd [#allocation10], 4294966272  ;;  %v707_v0 = vmov 0.0   ;;  %vm708_vm0 = vmmov 0   ;;  %v557_v1 = vld [vmem:[#allocation6] sm:$0xff]   ;;  %v558_v2 = vld [vmem:[#allocation6 + $0x8] sm:$0xff]   ;;  %v176_v34 = vlaneseq }
  0x4a   :  { %500 = vmatprep.subr.bf16.mxu0 %v707_v0  ;;  %504 = vmatprep.mubr.msk.bf16.mxu0 %vm708_vm0, %v707_v0  ;;  %v78_v3 = vld [vmem:[#allocation3] sm:$0xff]  ;;  %vm96_vm1 = vcmask 261120   ;;  %v559_v5 = vld [vmem:[#allocation8] sm:$0xff]   ;;  %v561_v7 = vld [vmem:[#allocation8 + $0x10] sm:$0xff]   ;;  %s709_s1 = smov [#allocation11]  }
  0x4b   :  { %508 = vmatprep.subr.bf16.mxu1 %v707_v0  ;;  %524 = vmatprep.mubr.msk.bf16.mxu1 %vm708_vm0, %v707_v0  ;;  %v79_v4 = vpack.c.bf16 %v78_v3, %v78_v3  ;;  %v560_v6 = vld [vmem:[#allocation8 + $0x8] sm:$0xff]   ;;  %v562_v8 = vld [vmem:[#allocation8 + $0x18] sm:$0xff]   ;;  %v563_v9 = vld [vmem:[#allocation8 + $0x20] sm:$0xff]   ;;  %v816_v35 = vshrl.u32 %v176_v34, 7  ;;  %s447_s22 = sshll.u32 %s709_s1, 4  ;;  %s448_s22 = int_to_ptr.vmem [resolvable:$true] %s447_s22 }
  0x4c   :  { %501 = vmatpush3.bf16.msra.mxu0 %v557_v1  ;;  %509 = vmatpush3.bf16.msra.mxu1 %v559_v5  ;;  %v564_v10 = vld [vmem:[#allocation8 + $0x28] sm:$0xff]   ;;  %v565_v11 = vld [vmem:[#allocation8 + $0x30] sm:$0xff]   ;;  %v566_v12 = vld [vmem:[#allocation8 + $0x38] sm:$0xff]   ;;  %s671_s23 = scalar_lea.vmem %s448_s22, 128  ;;  %p676_p5 = scmp.lt.s32.totalorder %s448_s22, %s448_s22 }
  0x4d   :  { %502 = vmatprep.subr.bf16.mxu0 %v707_v0  ;;  %510 = vmatprep.subr.bf16.mxu1 %v707_v0  ;;  %v155_v36 = vld [vmem:[%s851_s4] sm:$0xff]  ;;  %v178_v37 = vsub.s32 0, %v816_v35  ;;  %v183_v38 = vsub.s32 1, %v816_v35  ;;  %v567_v47 = vld [vmem:[#allocation9] sm:$0xff]   ;;  %v569_v49 = vld [vmem:[#allocation9 + $0x10] sm:$0xff]   ;;  %p672_p4 = scmp.ne.s32.totalorder %s448_s22, %s671_s23  ;;  %p677_p6 = scmp.lt.s32.totalorder %s671_s23, %s671_s23 }
  0x4e   :  { %v568_v48 = vld [vmem:[#allocation9 + $0x8] sm:$0xff]   ;;  %v570_v50 = vld [vmem:[#allocation9 + $0x18] sm:$0xff]   ;;  %v571_v51 = vld [vmem:[#allocation9 + $0x20] sm:$0xff]  }
  0x4f   :  { %v184_v42 = vrot.slane %v155_v36, %v183_v38  ;;  %v572_v52 = vld [vmem:[#allocation9 + $0x28] sm:$0xff]   ;;  %v573_v53 = vld [vmem:[#allocation9 + $0x30] sm:$0xff]   ;;  %v574_v54 = vld [vmem:[#allocation9 + $0x38] sm:$0xff]   ;;  %p678_p7 = por %p677_p6, %p676_p5 }
  0x50   :  { %503 = vmatpush3.bf16.msra.mxu0 %v558_v2  ;;  %511 = vmatpush3.bf16.msra.mxu1 %v560_v6 }
  0x51   :  { %528 = vmatprep.subr.bf16.mxu0 %v707_v0  ;;  %512 = vmatprep.subr.bf16.mxu1 %v707_v0  ;;  %p679_p8 = pnand %p678_p7, %p672_p4 }
  0x53   :  { %505 = vmatmul.mubr.msk.bf16.vlgmr.msra.gmra.mrb[0].mxu0 %vm96_vm1, %v79_v4 }
  0x54   :  { %544 = vmatprep.mubr.msk.bf16.mxu0 %vm708_vm0, %v707_v0  ;;  %513 = vmatpush3.bf16.msra.mxu1 %v561_v7 }
  0x55   :  { %514 = vmatprep.subr.bf16.mxu1 %v707_v0  ;;  %529 = vmatpush3.bf16.msra.mxu0 %v567_v47 }
  0x56   :  { %530 = vmatprep.subr.bf16.mxu0 %v707_v0 }
  0x58   :  { %515 = vmatpush3.bf16.msra.mxu1 %v562_v8 }
  0x59   :  { %516 = vmatprep.subr.bf16.mxu1 %v707_v0  ;;  %531 = vmatpush3.bf16.msra.mxu0 %v568_v48 }
  0x5a   :  { %532 = vmatprep.subr.bf16.mxu0 %v707_v0 }
  0x5c   :  { %517 = vmatpush3.bf16.msra.mxu1 %v563_v9 }
  0x5d   :  { %518 = vmatprep.subr.bf16.mxu1 %v707_v0  ;;  %533 = vmatpush3.bf16.msra.mxu0 %v569_v49 }
  0x5e   :  { %534 = vmatprep.subr.bf16.mxu0 %v707_v0 }
  0x60   :  { %519 = vmatpush3.bf16.msra.mxu1 %v564_v10 }
  0x61   :  { %520 = vmatprep.subr.bf16.mxu1 %v707_v0  ;;  %535 = vmatpush3.bf16.msra.mxu0 %v570_v50 }
  0x62   :  { %536 = vmatprep.subr.bf16.mxu0 %v707_v0 }
  0x64   :  { %521 = vmatpush3.bf16.msra.mxu1 %v565_v11 }
  0x65   :  { %522 = vmatprep.subr.bf16.mxu1 %v707_v0  ;;  %537 = vmatpush3.bf16.msra.mxu0 %v571_v51 }
  0x66   :  { %538 = vmatprep.subr.bf16.mxu0 %v707_v0 }
  0x68   :  { %523 = vmatpush3.bf16.msra.mxu1 %v566_v12  ;;  %v313_v12 = vsub.s32 2, %v816_v35 }
  0x69   :  { %539 = vmatpush3.bf16.msra.mxu0 %v572_v52 }
  0x6a   :  { %540 = vmatprep.subr.bf16.mxu0 %v707_v0 }
  0x6d   :  { %541 = vmatpush3.bf16.msra.mxu0 %v573_v53 }
  0x6e   :  { %542 = vmatprep.subr.bf16.mxu0 %v707_v0 }
  0x71   :  { %543 = vmatpush3.bf16.msra.mxu0 %v574_v54 }
 0x126   :  { %v134_v13 = vpop.f32.mrb[0].mxu0 }
 0x127   :  { %v157_v14 = vrot.slane %v134_v13, 4  ;;  %v506_v15 = vpop.f32.mrb[1].mxu0 }
 0x128   :  { %v137_v16 = vpop.f32.mrb[2].mxu0 }
 0x129   :  { %v158_v17 = vadd.f32 %v157_v14, %v134_v13  ;;  %v507_v18 = vpop.f32.mrb[3].mxu0 }
 0x12b   :  { %v159_v19 = vrot.slane %v158_v17, 2 }
 0x12d   :  { %v160_v20 = vadd.f32 %v159_v19, %v158_v17 }
 0x12f   :  { %v161_v21 = vrot.slane %v160_v20, 1 }
 0x131   :  { %v162_v22 = vadd.f32 %v161_v21, %v160_v20 }
 0x133   :  { %v163_v23 = vmul.f32 0.125, %v162_v22  ;;  %v469_v22 = vld [vmem:[%s852_s5] ss:$0 sm:$0xff] }
 0x135   :  { %v164_v24 = vsub.f32 %v134_v13, %v163_v23  ;;  %v318_v13 = vsub.s32 3, %v816_v35 }
 0x137   :  { %v165_v25 = vmul.f32 %v164_v24, %v164_v24  ;;  %v319_v17 = vrot.slane %v155_v36, %v318_v13 }
 0x139   :  { %v166_v26 = vrot.slane %v165_v25, 4 }
 0x13b   :  { %v167_v27 = vadd.f32 %v166_v26, %v165_v25 }
 0x13d   :  { %v168_v28 = vrot.slane %v167_v27, 2 }
 0x13f   :  { %v169_v29 = vadd.f32 %v168_v28, %v167_v27 }
 0x141   :  { %v170_v30 = vrot.slane %v169_v29, 1 }
 0x143   :  { %v171_v31 = vadd.f32 %v170_v30, %v169_v29 }
 0x145   :  { %v172_v32 = vmul.f32 0.125, %v171_v31 }
 0x147   :  { %v173_v33 = vadd.f32 1e-05, %v172_v32 }
 0x149   :  { %575 = vrsqrt.f32 %v173_v33 }
 0x153   :  { %v576_v39 = vpop.eup %575 }
 0x154   :  { %v175_v40 = vmul.f32 %v576_v39, %v155_v36 }
 0x156   :  { %v179_v41 = vrot.slane %v175_v40, %v178_v37 }
 0x158   :  { %v180_v43 = vmul.f32 %v179_v41, %v164_v24 }
 0x15a   :  { %v185_v44 = vadd.f32 %v184_v42, %v180_v43 }
 0x15c   :  { %v186_v45 = vmax.f32 %v185_v44, 0.0 }
 0x15e   :  { %v187_v46 = vpack.c.bf16 %v186_v45, %v186_v45 }
 0x160   :  { %525 = vmatmul.mubr.bf16.vlgmr.msra.gmra.mrb[0].mxu1 %v187_v46 }
 0x233   :  { %v286_v55 = vpop.f32.mrb[0].mxu1 }
 0x234   :  { %v292_v56 = vrot.slane %v286_v55, 4  ;;  %v526_v57 = vpop.f32.mrb[1].mxu1 }
 0x235   :  { %v289_v58 = vpop.f32.mrb[2].mxu1 }
 0x236   :  { %v293_v59 = vadd.f32 %v292_v56, %v286_v55  ;;  %v527_v60 = vpop.f32.mrb[3].mxu1 }
 0x238   :  { %v294_v61 = vrot.slane %v293_v59, 2 }
 0x23a   :  { %v295_v62 = vadd.f32 %v294_v61, %v293_v59 }
 0x23c   :  { %v296_v63 = vrot.slane %v295_v62, 1 }
 0x23e   :  { %v297_v1 = vadd.f32 %v296_v63, %v295_v62 }
 0x240   :  { %v298_v2 = vmul.f32 0.125, %v297_v1 }
 0x242   :  { %v299_v3 = vsub.f32 %v286_v55, %v298_v2 }
 0x244   :  { %v300_v4 = vmul.f32 %v299_v3, %v299_v3 }
 0x246   :  { %v301_v5 = vrot.slane %v300_v4, 4 }
 0x248   :  { %v302_v6 = vadd.f32 %v301_v5, %v300_v4 }
 0x24a   :  { %v303_v7 = vrot.slane %v302_v6, 2 }
 0x24c   :  { %v304_v8 = vadd.f32 %v303_v7, %v302_v6 }
 0x24e   :  { %v305_v0 = vrot.slane %v304_v8, 1 }
 0x250   :  { %v306_v9 = vadd.f32 %v305_v0, %v304_v8 }
 0x252   :  { %v307_v10 = vmul.f32 0.125, %v306_v9 }
 0x254   :  { %v308_v11 = vadd.f32 1e-05, %v307_v10 }
 0x256   :  { %577 = vrsqrt.f32 %v308_v11 }
 0x260   :  { %v578_v14 = vpop.eup %577 }
 0x261   :  { %v310_v15 = vmul.f32 %v578_v14, %v155_v36 }
 0x263   :  { %v314_v16 = vrot.slane %v310_v15, %v313_v12 }
 0x265   :  { %v315_v18 = vmul.f32 %v314_v16, %v299_v3 }
 0x267   :  { %v320_v19 = vadd.f32 %v319_v17, %v315_v18 }
 0x269   :  { %v321_v20 = vmax.f32 %v320_v19, 0.0 }
 0x26b   :  { %v322_v21 = vpack.c.bf16 %v321_v20, %v321_v20 }
 0x26d   :  { %545 = vmatmul.mubr.bf16.vlgmr.msra.gmra.mrb[4].mxu0 %v322_v21 }
 0x340   :  { %v428_v23 = vpop.f32.mrb[4].mxu0 }
 0x341   :  { %v429_v24 = vadd.f32 %v469_v22, %v428_v23  ;;  %v546_v25 = vpop.f32.mrb[5].mxu0 }
 0x342   :  { %v431_v26 = vpop.f32.mrb[6].mxu0 }
 0x343   :  { %v478_v27 = vmul.f32 -1.442695, %v429_v24  ;;  %v547_v28 = vpop.f32.mrb[7].mxu0 }
 0x345   :  { %579 = vpow2.f32 %v478_v27 }
 0x34f   :  { %v580_v29 = vpop.eup %579 }
 0x350   :  { %v437_v30 = vadd.f32 1.0, %v580_v29 }
 0x352   :  { %581 = vrcp.f32 %v437_v30 }
 0x35c   :  { %v582_v31 = vpop.eup %581 }
 0x35d   :  { %440 = vst [vmem:[#allocation11] sm:$0xff] %v582_v31 }
 0x35e   :  { %682 = shalt.err (!%p679_p8)
}
 0x35f   :  { %s683_s25 = scalar_lea.hbm %s853_s6, 128 }
 0x360   :  { %p684_p9 = scmp.ne.s32.totalorder %s853_s6, %s683_s25  ;;  %p687_p10 = scmp.lt.u32.totalorder %s683_s25, %s853_s6 }
 0x362   :  { %p689_p11 = pnand %p687_p10, %p684_p9 }
 0x364   :  { %692 = shalt.err (!%p689_p11)
}
 0x365   :  { %450 = dma.vmem_to_hbm [thread:$0]  %s448_s22, 128, %s853_s6, [#allocation5]  }
 0x366   :  { %699 = dma.done.wait [#allocation5], 128  }
 0x367   :  { %700 = vsyncadd [#allocation5], 4294967168 }
 0x368   :  { %454 = vsyncpa [#allocation4], 1 }
 0x369   :  { %455 = vsyncpa [#allocation7], 1 }
 0x36a   :  { %456 = vsyncpa [#allocation10], 1 }
 0x36b   :  { %457 = vsyncpa [#allocation5], 1 }

</bundles_post_ra>
